<compile_context>
chip_gen: v7x
topology: tpu7x:2x2x1
jax: 0.10.0
libtpu: 0.0.40
codegen_flags: <defaults>
</compile_context>

<pallas_src>
import functools

import jax
import jax.numpy as jnp
from jax import lax
from jax.experimental import pallas as pl
from jax.experimental.pallas import tpu as pltpu


def _round_up(x, m):
    return ((x + m - 1) // m) * m


@functools.lru_cache(maxsize=None)
def _roll_shift_sign():
    """Probe pltpu.roll's shift convention once on-device (outside jit).

    pltpu.roll is documented to follow jnp.roll (out[i] = in[i - shift], i.e.
    shift = -offset); probing guarantees a convention difference can never
    silently turn the 3x3 conv into its spatially flipped version.
    """
    def k(x_ref, o_ref):
        o_ref[...] = pltpu.roll(x_ref[...], 1, 0)

    x = jnp.arange(8 * 128, dtype=jnp.float32).reshape(8, 128)
    y = pl.pallas_call(k, out_shape=jax.ShapeDtypeStruct((8, 128), jnp.float32))(x)
    return -1 if bool(jnp.array_equal(y, jnp.roll(x, 1, axis=0))) else 1


def basic_block_kernel(x_ref, w1_ref, b1_ref, w2_ref, b2_ref, mask_ref, o_ref,
                       xpad_ref, lhs_ref, *, B_t, H, W, Wp, Cp, roll_sign):
    # x_ref:    (B_t*H*W, Cp) f32   flattened NHWC input rows (lane-dense channels)
    # w*_ref:   (9*Cp, Cp)    bf16  tap-major im2col weights, BN scale folded in
    # b*_ref:   (1, Cp)       f32   folded BN bias
    # mask_ref: (R, 1)        f32   1.0 at data positions of the padded layout, else 0
    # o_ref:    (B_t*H*W, Cp) f32   output
    # xpad_ref: (R, Cp)       f32   spatially padded input (also the exact f32 residual)
    # lhs_ref:  (R, 9*Cp)     bf16  shared im2col LHS for both convs
    HW = H * W
    Rimg = (H + 2) * Wp          # per image: top halo + H data rows + bottom halo
    R = B_t * Rimg

    # ---- stage the spatially padded input: one bulk zero fill + aligned band writes
    xpad_ref[...] = jnp.zeros((R, Cp), jnp.float32)
    for b in range(B_t):
        for h in range(H):
            dst = b * Rimg + (h + 1) * Wp          # multiple of Wp -> 8-aligned sublanes
            src = b * HW + h * W
            xpad_ref[dst:dst + W, :] = x_ref[src:src + W, :]

    xpad = xpad_ref[...]                           # f32, reused as exact residual
    bias1 = b1_ref[...]
    bias2 = b2_ref[...]
    mask = mask_ref[...]

    def conv3x3(src_f32, w_ref):
        # Tap (dy, dx) needs src[p + (dy-1)*Wp + (dx-1)] for every flat padded
        # position p.  Shift the whole slab with XLU rolls, store each tap
        # lane-aligned into the bf16 LHS scratch, and contract all 9 taps in a
        # single K = 9*Cp MXU matmul -> accumulation stays inside the MXU, no
        # per-tap f32 accumulator traffic, no misaligned slices.
        for t in range(9):
            dy, dx = divmod(t, 3)
            off = (dy - 1) * Wp + (dx - 1)
            col = src_f32 if off == 0 else pltpu.roll(src_f32, (roll_sign * off) % R, 0)
            lhs_ref[:, t * Cp:(t + 1) * Cp] = col.astype(jnp.bfloat16)
        return jnp.dot(lhs_ref[...], w_ref[...], preferred_element_type=jnp.float32)

    # ---- conv1 -> BN1 (scale folded into w1) -> ReLU, all slab-wide; zero the
    #      halo / pad positions so they act as conv2's zero padding.
    y = conv3x3(xpad, w1_ref)
    y = jnp.maximum(y + bias1, 0.0) * mask

    # ---- conv2 -> BN2 -> + f32 residual -> ReLU, slab-wide (broadcasts hoisted)
    z = conv3x3(y, w2_ref)
    out_slab = jnp.maximum(z + bias2 + xpad, 0.0)

    # ---- writeback: lane-dense, sublane-aligned band stores (wrap/halo rows dropped)
    for b in range(B_t):
        for h in range(H):
            src = b * Rimg + (h + 1) * Wp
            dst = b * HW + h * W
            o_ref[dst:dst + W, :] = out_slab[src:src + W, :].astype(o_ref.dtype)


def _pick_batch_tile(N, H, W, Wp, Cp):
    """Largest batch tile whose per-step VMEM footprint stays well inside the
    smallest scoped VMEM default (16 MiB on v5e; 32 MiB on v6e/v7x), which also
    leaves ample headroom under v7x's 64 MiB physical VMEM."""
    budget = 12 * 1024 * 1024
    HW = H * W
    Rimg = (H + 2) * Wp
    est = 0
    for bt in (8, 4, 2, 1):
        if N % bt:
            continue
        R = bt * Rimg
        est = (
            2 * 2 * bt * HW * Cp * 4       # x + out blocks, double-buffered
            + 2 * 2 * 9 * Cp * Cp * 2      # w1 + w2 (constant index -> fetched once)
            + 2 * 2 * Cp * 4               # biases
            + 2 * R * 128 * 4              # (R, 1) mask block (lane-padded layout)
            + R * Cp * 4                   # xpad scratch (f32)
            + R * 9 * Cp * 2               # shared bf16 im2col LHS scratch
            + 3 * R * Cp * 4               # y / z / out_slab f32 temporaries
        )
        if est <= budget or bt == 1:
            return bt, est
    return 1, est


def basic_block_pallas(x_nhwc, w1, scale1, bias1, w2, scale2, bias2, roll_sign=-1):
    """x_nhwc: (N,H,W,C) f32; w*: (3,3,C,C) HWIO; scale*/bias*: (1,C) folded
    inference BatchNorm (scale = gamma/sqrt(var+eps), bias = beta - mean*scale)."""
    N, H, W, C = x_nhwc.shape
    assert w1.shape == (3, 3, C, C) and w2.shape == (3, 3, C, C), \
        "BasicBlock w/o downsample needs inplanes == planes (stride=1)"

    Cp = _round_up(C, 128)       # lane-dense channel padding
    Wp = _round_up(W + 1, 8)     # >=1 zero column between rows; 8-aligned row pitch
    HW = H * W
    Rimg = (H + 2) * Wp

    B_t, _vmem_est = _pick_batch_tile(N, H, W, Wp, Cp)
    R = B_t * Rimg

    def prep_w(w, scale):
        wf = w * scale.reshape(1, 1, 1, C)                          # fold BN scale
        wf = jnp.pad(wf, ((0, 0), (0, 0), (0, Cp - C), (0, Cp - C)))
        return wf.reshape(9 * Cp, Cp).astype(jnp.bfloat16)          # tap-major K layout

    w1p = prep_w(w1, scale1)
    w2p = prep_w(w2, scale2)
    b1p = jnp.pad(bias1.reshape(1, C), ((0, 0), (0, Cp - C)))
    b2p = jnp.pad(bias2.reshape(1, C), ((0, 0), (0, Cp - C)))
    xp = jnp.pad(x_nhwc, ((0, 0), (0, 0), (0, 0), (0, Cp - C))).reshape(N * HW, Cp)

    # 1.0 at data positions of the flat padded layout, 0.0 at halo rows / pad cols.
    mask_img = jnp.zeros((H + 2, Wp), jnp.float32).at[1:H + 1, :W].set(1.0)
    mask = jnp.tile(mask_img, (B_t, 1)).reshape(R, 1)

    kernel = functools.partial(basic_block_kernel, B_t=B_t, H=H, W=W, Wp=Wp,
                               Cp=Cp, roll_sign=roll_sign)

    grid_spec = pltpu.PrefetchScalarGridSpec(
        num_scalar_prefetch=0,
        grid=(N // B_t,),
        in_specs=[
            pl.BlockSpec((B_t * HW, Cp), lambda n: (n, 0)),    # x (batch-blocked)
            pl.BlockSpec((9 * Cp, Cp), lambda n: (0, 0)),      # w1 (resident)
            pl.BlockSpec((1, Cp), lambda n: (0, 0)),           # b1
            pl.BlockSpec((9 * Cp, Cp), lambda n: (0, 0)),      # w2 (resident)
            pl.BlockSpec((1, Cp), lambda n: (0, 0)),           # b2
            pl.BlockSpec((R, 1), lambda n: (0, 0)),            # validity mask
        ],
        out_specs=pl.BlockSpec((B_t * HW, Cp), lambda n: (n, 0)),
        scratch_shapes=[
            pltpu.VMEM((R, Cp), jnp.float32),        # padded input / f32 residual
            pltpu.VMEM((R, 9 * Cp), jnp.bfloat16),   # shared im2col LHS
        ],
    )

    out = pl.pallas_call(
        kernel,
        out_shape=jax.ShapeDtypeStruct((N * HW, Cp), jnp.float32),
        grid_spec=grid_spec,
        compiler_params=pltpu.CompilerParams(
            dimension_semantics=("parallel",)),      # steps independent -> both v7x TCs
    )(xp, w1p, b1p, w2p, b2p, mask)

    return out.reshape(N, H, W, Cp)[..., :C]


def basic_block_reference(x_nhwc, w1, scale1, bias1, w2, scale2, bias2):
    dn = lax.conv_dimension_numbers(x_nhwc.shape, w1.shape, ("NHWC", "HWIO", "NHWC"))
    y = lax.conv_general_dilated(x_nhwc, w1, (1, 1), "SAME", dimension_numbers=dn)
    y = jnp.maximum(y * scale1[0] + bias1[0], 0.0)
    z = lax.conv_general_dilated(y, w2, (1, 1), "SAME", dimension_numbers=dn)
    z = jnp.maximum(z * scale2[0] + bias2[0] + x_nhwc, 0.0)
    return z


if __name__ == "__main__":
    N, C, H, W = 2, 4, 16, 16  # inplanes = planes = 4, stride = 1
    key = jax.random.PRNGKey(0)
    kx, kw1, kw2, kg1, kb1, km1, kv1, kg2, kb2, km2, kv2 = jax.random.split(key, 11)

    # Input in PyTorch NCHW, transposed to NHWC for the kernel wrapper.
    x_nchw = jax.random.normal(kx, (N, C, H, W), jnp.float32)
    x_nhwc = jnp.transpose(x_nchw, (0, 2, 3, 1))

    # Conv weights (HWIO); BatchNorm (inference) params with deterministic init.
    w1 = jax.random.normal(kw1, (3, 3, C, C), jnp.float32) * 0.1
    w2 = jax.random.normal(kw2, (3, 3, C, C), jnp.float32) * 0.1
    eps = 1e-5

    def fold_bn(kg, kb, km, kv):
        gamma = 1.0 + 0.1 * jax.random.normal(kg, (C,), jnp.float32)
        beta = 0.1 * jax.random.normal(kb, (C,), jnp.float32)
        mean = 0.1 * jax.random.normal(km, (C,), jnp.float32)
        var = jnp.abs(jax.random.normal(kv, (C,), jnp.float32)) + 0.5
        scale = gamma / jnp.sqrt(var + eps)
        bias = beta - mean * scale
        return scale.reshape(1, C), bias.reshape(1, C)

    scale1, bias1 = fold_bn(kg1, kb1, km1, kv1)
    scale2, bias2 = fold_bn(kg2, kb2, km2, kv2)

    roll_sign = _roll_shift_sign()   # probe outside jit (needs a concrete bool)
    run = jax.jit(functools.partial(basic_block_pallas, roll_sign=roll_sign))
    out = jax.block_until_ready(run(x_nhwc, w1, scale1, bias1, w2, scale2, bias2))

    ref = basic_block_reference(x_nhwc, w1, scale1, bias1, w2, scale2, bias2)
    assert out.shape == (N, H, W, C)
    # bf16 matmul inputs (f32 accumulation + exact f32 residual) -> looser tolerance.
    assert jnp.allclose(out, ref, atol=3e-2, rtol=3e-2), "mismatch vs reference"

    # Output back to NCHW if the caller wants PyTorch layout:
    _ = jnp.transpose(out, (0, 3, 1, 2))
    print("KERNEL_OK")
</pallas_src>

<mosaic_0001>
module attributes {stable_mosaic.version = 11 : i64} {
  func.func @k(%arg0: memref<8x128xf32, #tpu.memory_space<vmem>>, %arg1: memref<8x128xf32, #tpu.memory_space<vmem>>) attributes {dimension_semantics = [], scalar_prefetch = 0 : i64, scratch_operands = 0 : i64, tpu.core_type = #tpu.core_type<tc>} {
    %c0 = arith.constant 0 : index
    %c0_0 = arith.constant 0 : index
    %0 = vector.load %arg0[%c0, %c0_0] : memref<8x128xf32, #tpu.memory_space<vmem>>, vector<8x128xf32>
    %c1_i32 = arith.constant 1 : i32
    %1 = tpu.dynamic_rotate %0 by %c1_i32 dim 0 : vector<8x128xf32>, i32 -> vector<8x128xf32>
    %c0_1 = arith.constant 0 : index
    %c0_2 = arith.constant 0 : index
    %2 = vector.load %arg1[%c0_1, %c0_2] : memref<8x128xf32, #tpu.memory_space<vmem>>, vector<8x128xf32>
    tpu.vector_store %arg1[%c0_1, %c0_2], %1 {strides = array<i32>} : memref<8x128xf32, #tpu.memory_space<vmem>>, vector<8x128xf32>,
    return
  }
}

</mosaic_0001>

<bundles_post_ra>
// kernel: tpu_custom_call.1
= control target key start
LH: loop header
LB: loop body
LE: loop exit
PB: predicated region body
PF: predicated region fallthrough
CT: control target
= control target key end

     0   :  { %6 = vsyncpa [#allocation3], 0  ;;  %s125_s0 = inlined_call_operand.hbm [shape: f32[8,128], index: 0, kind: input, shape index: {}]   ;;  %s126_s1 = inlined_call_operand.hbm [shape: f32[8,128], index: 1, kind: output, shape index: {}]  }
   0x1   :  { %7 = vsyncpa [#allocation4], 0  ;;  %s89_s6 = smov [#allocation2]   ;;  %s41_s10 = scalar_lea.hbm %s125_s0, 128 }
   0x2   :  { %s14_s7 = sshll.u32 %s89_s6, 4  ;;  %p42_p0 = scmp.ne.s32.totalorder %s125_s0, %s41_s10  ;;  %s15_s7 = int_to_ptr.vmem [resolvable:$true] %s14_s7 }
   0x3   :  { %p45_p1 = scmp.lt.u32.totalorder %s41_s10, %s125_s0 }
   0x5   :  { %p47_p2 = pnand %p45_p1, %p42_p0 }
   0x7   :  { %50 = shalt.err (!%p47_p2)
}
   0x8   :  { %s51_s15 = scalar_lea.vmem %s15_s7, 128  ;;  %p56_p4 = scmp.lt.s32.totalorder %s15_s7, %s15_s7 }
   0x9   :  { %p52_p3 = scmp.ne.s32.totalorder %s15_s7, %s51_s15  ;;  %p57_p5 = scmp.lt.s32.totalorder %s51_s15, %s51_s15 }
   0xb   :  { %p58_p6 = por %p57_p5, %p56_p4 }
   0xd   :  { %p59_p7 = pnand %p58_p6, %p52_p3 }
   0xf   :  { %62 = shalt.err (!%p59_p7)
}
  0x10   :  { %17 = dma.hbm_to_vmem [thread:$0]  %s125_s0, 128, %s15_s7, [#allocation3]  }
  0x11   :  { %85 = dma.done.wait [#allocation3], 128  }
  0x12   :  { %86 = vsyncadd [#allocation3], 4294967168  ;;  %s90_s18 = smov [#allocation5]   ;;  %v21_v0 = vld [vmem:[#allocation2] sm:$0xff] }
  0x13   :  { %s30_s19 = sshll.u32 %s90_s18, 4  ;;  %v22_v1 = vrot.slane %v21_v0, 7  ;;  %s31_s19 = int_to_ptr.vmem [resolvable:$true] %s30_s19 }
  0x14   :  { %s63_s20 = scalar_lea.vmem %s31_s19, 128  ;;  %p68_p9 = scmp.lt.s32.totalorder %s31_s19, %s31_s19 }
  0x15   :  { %23 = vst [vmem:[#allocation5] sm:$0xff] %v22_v1  ;;  %p64_p8 = scmp.ne.s32.totalorder %s31_s19, %s63_s20  ;;  %p69_p10 = scmp.lt.s32.totalorder %s63_s20, %s63_s20 }
  0x17   :  { %p70_p11 = por %p69_p10, %p68_p9 }
  0x19   :  { %p71_p12 = pnand %p70_p11, %p64_p8 }
  0x1b   :  { %74 = shalt.err (!%p71_p12)
}
  0x1c   :  { %s75_s23 = scalar_lea.hbm %s126_s1, 128 }
  0x1d   :  { %p76_p13 = scmp.ne.s32.totalorder %s126_s1, %s75_s23  ;;  %p79_p0 = scmp.lt.u32.totalorder %s75_s23, %s126_s1 }
  0x1f   :  { %p81_p1 = pnand %p79_p0, %p76_p13 }
  0x21   :  { %84 = shalt.err (!%p81_p1)
}
  0x22   :  { %33 = dma.vmem_to_hbm [thread:$0]  %s31_s19, 128, %s126_s1, [#allocation4]  }
  0x23   :  { %87 = dma.done.wait [#allocation4], 128  }
  0x24   :  { %88 = vsyncadd [#allocation4], 4294967168 }
  0x25   :  { %37 = vsyncpa [#allocation3], 1 }
  0x26   :  { %38 = vsyncpa [#allocation4], 1 }

</bundles_post_ra>
